<compile_context>
chip_gen: v7x
topology: tpu7x:2x2x1
jax: 0.10.0
libtpu: 0.0.40
codegen_flags: <defaults>
</compile_context>

<pallas_src>
import functools
from typing import NamedTuple, Tuple

import jax
import jax.numpy as jnp
from jax.experimental import pallas as pl
from jax.experimental.pallas import tpu as pltpu

_LANE = 128


def _round_up(x, m):
    return (x + m - 1) // m * m


# --------------------------------------------------------------------------
# Kernel
# --------------------------------------------------------------------------
def _policy_mlp_kernel(scale_ref, x_ref, *refs, num_linear: int):
    """refs = (W0, b0, W1, b1, ..., W_last, b_last, out).

    Hidden layers: matmul + bias + ReLU. Final layer: matmul + bias + tanh,
    then scaled by the SMEM scalar. Matmul operands are in the params' stored
    dtype (bf16-friendly); accumulation and elementwise math stay f32.
    """
    out_ref = refs[-1]
    param_refs = refs[:-1]

    h = x_ref[...]
    for li in range(num_linear):
        w_ref = param_refs[2 * li]          # [in_pad, out_pad]  (bf16 or f32)
        b_ref = param_refs[2 * li + 1]      # [1, out_pad]       (f32)
        h = jnp.dot(
            h.astype(w_ref.dtype), w_ref[...],
            preferred_element_type=jnp.float32,
        )
        h = h + b_ref[...].astype(jnp.float32)
        if li < num_linear - 1:
            h = jnp.maximum(h, 0.0)         # ReLU (f32 VPU path)
        else:
            h = jnp.tanh(h)                 # Tanh (f32 EUP path)
    out_ref[...] = (h * scale_ref[0, 0]).astype(out_ref.dtype)


# --------------------------------------------------------------------------
# Parameter preparation (done ONCE, not per forward call)
# --------------------------------------------------------------------------
class PreparedPolicyParams(NamedTuple):
    padded_params: Tuple[jax.Array, ...]   # (W0, b0, W1, b1, ...), lane-padded
    obs_size: int
    action_size: int
    obs_pad: int
    act_pad: int
    feat_max: int
    param_bytes: int
    param_dtype: jnp.dtype


def prepare_policy_params(weights, biases, param_dtype=jnp.bfloat16):
    """Pad feature dims to multiples of 128 and cast weights to param_dtype.

    weights: list of [in_features, out_features] arrays.
    biases:  list of [out_features] arrays.
    """
    num_linear = len(weights)
    assert len(biases) == num_linear
    param_dtype = jnp.dtype(param_dtype)

    in_pad = [_round_up(w.shape[0], _LANE) for w in weights]
    out_pad = [_round_up(w.shape[1], _LANE) for w in weights]

    padded = []
    param_bytes = 0
    for w, b, ip, op in zip(weights, biases, in_pad, out_pad):
        wp = (jnp.zeros((ip, op), param_dtype)
              .at[: w.shape[0], : w.shape[1]].set(w.astype(param_dtype)))
        bp = (jnp.zeros((1, op), jnp.float32)
              .at[0, : b.shape[0]].set(b.astype(jnp.float32)))
        padded.extend([wp, bp])
        param_bytes += wp.size * wp.dtype.itemsize + bp.size * bp.dtype.itemsize

    return PreparedPolicyParams(
        padded_params=tuple(padded),
        obs_size=weights[0].shape[0],
        action_size=weights[-1].shape[1],
        obs_pad=in_pad[0],
        act_pad=out_pad[-1],
        feat_max=max(in_pad + out_pad),
        param_bytes=param_bytes,
        param_dtype=param_dtype,
    )


# --------------------------------------------------------------------------
# Forward wrapper
# --------------------------------------------------------------------------
def _vmem_budget_bytes():
    """Generation-aware VMEM budget (v5e/v6e: 128 MiB, v7x: 64 MiB physical)."""
    try:
        cap = int(pltpu.get_tpu_info().vmem_capacity_bytes)
    except Exception:
        cap = 64 * 1024 * 1024          # conservative fallback (v7x size)
    vmem_limit = int(cap * 0.8)          # scoped-VMEM request for the kernel
    budget = int(vmem_limit * 0.85)      # headroom for compiler scratch
    return budget, vmem_limit


def _resident_spec(shape):
    """VMEM-resident param: constant index_map + single buffer (no waste)."""
    try:
        return pl.BlockSpec(shape, lambda i: (0, 0),
                            memory_space=pltpu.MemorySpace.VMEM,
                            pipeline_mode=pl.Buffered(1))
    except TypeError:
        # Older API without pipeline_mode: fall back to default buffering.
        return pl.BlockSpec(shape, lambda i: (0, 0),
                            memory_space=pltpu.MemorySpace.VMEM)


def policy_network_forward(x, params: PreparedPolicyParams, action_scale,
                           *, max_batch_tile=1024):
    """Runs the full policy MLP in one pallas_call.

    x: [B, obs_space_size] (f32 or bf16). Returns [B, action_space_size]
    in x's dtype.
    """
    num_linear = len(params.padded_params) // 2
    batch, obs = x.shape
    assert obs == params.obs_size, "obs dim mismatch with prepared params"

    obs_p, act_p, feat_max = params.obs_pad, params.act_pad, params.feat_max
    compute_dtype = params.param_dtype
    out_dtype = x.dtype

    # bf16 packs 16 rows per sublane group -> min batch tile multiple is 16.
    tile_align = 16 if compute_dtype.itemsize == 2 else 8

    budget, vmem_limit = _vmem_budget_bytes()
    x_isz = compute_dtype.itemsize
    o_isz = jnp.dtype(out_dtype).itemsize

    def _tile_bytes(t):
        # Double-buffered x/out streaming tiles + in-kernel live temporaries
        # (cast matmul input + f32 accumulator + slack). Params are
        # single-buffered (Buffered(1)).
        io = 2 * t * obs_p * x_isz + 2 * t * act_p * o_isz
        working = 3 * t * feat_max * 4
        return params.param_bytes + io + working

    tb = _round_up(max(max_batch_tile, tile_align), tile_align)
    while tb > tile_align and _tile_bytes(tb) > budget:
        tb //= 2
    tb = max(tile_align, (tb // tile_align) * tile_align)
    tb = min(tb, _round_up(batch, tile_align))

    b_pad = _round_up(batch, tb)
    # v7x has 2 TensorCores: the "parallel" batch axis only shards across
    # them if the grid has >= 2 steps. Split when the batch is big enough.
    if b_pad // tb < 2 and b_pad >= 2 * tile_align:
        tb = _round_up((batch + 1) // 2, tile_align)
        b_pad = _round_up(batch, tb)

    # Pad + cast x only when padding is actually required.
    need_x_pad = (b_pad != batch) or (obs_p != obs)
    if need_x_pad:
        x_p = (jnp.zeros((b_pad, obs_p), compute_dtype)
               .at[:batch, :obs].set(x.astype(compute_dtype)))
    else:
        x_p = x  # kernel casts to the weights' dtype internally

    scale = jnp.full((1, 1), action_scale, jnp.float32)

    param_specs = [_resident_spec(p.shape) for p in params.padded_params]
    in_specs = (
        [
            pl.BlockSpec((1, 1), lambda i: (0, 0),
                         memory_space=pltpu.MemorySpace.SMEM),
            pl.BlockSpec((tb, obs_p), lambda i: (i, 0)),
        ]
        + param_specs
    )
    out_spec = pl.BlockSpec((tb, act_p), lambda i: (i, 0))

    flops = 2 * b_pad * sum(
        params.padded_params[2 * li].shape[0] * params.padded_params[2 * li].shape[1]
        for li in range(num_linear)
    )
    bytes_accessed = (
        x_p.size * x_p.dtype.itemsize
        + params.param_bytes
        + b_pad * act_p * o_isz
    )
    cost = pl.CostEstimate(
        flops=int(flops),
        transcendentals=int(b_pad * act_p),
        bytes_accessed=int(bytes_accessed),
    )

    kernel = functools.partial(_policy_mlp_kernel, num_linear=num_linear)

    out_p = pl.pallas_call(
        kernel,
        out_shape=jax.ShapeDtypeStruct((b_pad, act_p), out_dtype),
        grid=(b_pad // tb,),
        in_specs=in_specs,
        out_specs=out_spec,
        compiler_params=pltpu.CompilerParams(
            dimension_semantics=("parallel",),
            vmem_limit_bytes=vmem_limit,
        ),
        cost_estimate=cost,
    )(scale, x_p, *params.padded_params)

    if b_pad == batch and act_p == params.action_size:
        return out_p
    return out_p[:batch, :params.action_size]


# --------------------------------------------------------------------------
# Init + reference
# --------------------------------------------------------------------------
def init_policy_params(key, obs_space_size, action_space_size, num_hidden,
                       num_layers):
    """PyTorch nn.Linear-style init (uniform +/- 1/sqrt(fan_in)).
    Weights are returned already transposed to [in_features, out_features]."""
    dims = []
    in_dim = obs_space_size
    for _ in range(num_layers):
        dims.append((in_dim, num_hidden))
        in_dim = num_hidden
    dims.append((in_dim, action_space_size))

    weights, biases = [], []
    for i, (fan_in, fan_out) in enumerate(dims):
        kw, kb = jax.random.split(jax.random.fold_in(key, i))
        bound = 1.0 / jnp.sqrt(jnp.float32(fan_in))
        weights.append(jax.random.uniform(kw, (fan_in, fan_out), jnp.float32,
                                          -bound, bound))
        biases.append(jax.random.uniform(kb, (fan_out,), jnp.float32,
                                         -bound, bound))
    return weights, biases


def _reference_forward(x, weights, biases, action_scale, compute_dtype=None):
    """Pure-JAX reference. compute_dtype=None -> full f32 (HIGHEST precision);
    otherwise mimics the kernel's numerics (cast operands, f32 accumulate)."""
    h = x
    n = len(weights)
    for i, (w, b) in enumerate(zip(weights, biases)):
        if compute_dtype is None:
            acc = jnp.dot(h, w, precision=jax.lax.Precision.HIGHEST)
        else:
            acc = jnp.dot(h.astype(compute_dtype), w.astype(compute_dtype),
                          preferred_element_type=jnp.float32)
        h = acc + b
        h = jnp.maximum(h, 0.0) if i < n - 1 else jnp.tanh(h)
    return h * action_scale


# --------------------------------------------------------------------------
# Self-test
# --------------------------------------------------------------------------
if __name__ == "__main__":
    obs_space_size = 16
    action_space_size = 8
    num_hidden = 32
    num_layers = 2
    action_scale = 2.0

    key = jax.random.PRNGKey(0)
    k_x, k_p = jax.random.split(key)

    weights, biases = init_policy_params(
        k_p, obs_space_size, action_space_size, num_hidden, num_layers
    )
    prepared = prepare_policy_params(weights, biases, param_dtype=jnp.bfloat16)

    # Aligned and non-aligned batches (exercises batch padding path).
    for batch in (8, 5):
        x = jax.random.normal(jax.random.fold_in(k_x, batch),
                              (batch, obs_space_size), jnp.float32)
        action = jax.block_until_ready(
            policy_network_forward(x, prepared, action_scale)
        )
        assert action.shape == (batch, action_space_size)

        # Tight check against a reference with the kernel's bf16 numerics.
        ref_bf16 = _reference_forward(x, weights, biases, action_scale,
                                      compute_dtype=jnp.bfloat16)
        err = float(jnp.max(jnp.abs(action - ref_bf16)))
        assert jnp.allclose(action, ref_bf16, atol=1e-4, rtol=1e-4), (
            f"bf16-numerics mismatch at batch={batch}: max err {err}"
        )

        # Loose semantic check against the full-f32 module reference.
        ref_f32 = _reference_forward(x, weights, biases, action_scale)
        err32 = float(jnp.max(jnp.abs(action - ref_f32)))
        assert jnp.allclose(action, ref_f32, atol=5e-2, rtol=5e-2), (
            f"semantic mismatch at batch={batch}: max err {err32}"
        )

    print("KERNEL_OK")
</pallas_src>

<mosaic_0001>
module attributes {stable_mosaic.version = 11 : i64} {
  func.func @_policy_mlp_kernel(%arg0: i32, %arg1: memref<1x1xf32, #tpu.memory_space<smem>>, %arg2: memref<16x128xbf16, #tpu.memory_space<vmem>>, %arg3: memref<128x128xbf16, #tpu.memory_space<vmem>>, %arg4: memref<1x128xf32, #tpu.memory_space<vmem>>, %arg5: memref<128x128xbf16, #tpu.memory_space<vmem>>, %arg6: memref<1x128xf32, #tpu.memory_space<vmem>>, %arg7: memref<128x128xbf16, #tpu.memory_space<vmem>>, %arg8: memref<1x128xf32, #tpu.memory_space<vmem>>, %arg9: memref<16x128xf32, #tpu.memory_space<vmem>>) attributes {dimension_semantics = [#tpu.dimension_semantics<parallel>], iteration_bounds = array<i64: 1>, scalar_prefetch = 0 : i64, scratch_operands = 0 : i64, tpu.core_type = #tpu.core_type<tc>, window_params = [{transform_indices = @transform_0, window_bounds = array<i64: 1, 1>}, {transform_indices = @transform_1, window_bounds = array<i64: 16, 128>}, {pipeline_mode = #tpu.pipeline_mode<synchronous>, transform_indices = @transform_2, window_bounds = array<i64: 128, 128>}, {pipeline_mode = #tpu.pipeline_mode<synchronous>, transform_indices = @transform_3, window_bounds = array<i64: 1, 128>}, {pipeline_mode = #tpu.pipeline_mode<synchronous>, transform_indices = @transform_4, window_bounds = array<i64: 128, 128>}, {pipeline_mode = #tpu.pipeline_mode<synchronous>, transform_indices = @transform_5, window_bounds = array<i64: 1, 128>}, {pipeline_mode = #tpu.pipeline_mode<synchronous>, transform_indices = @transform_6, window_bounds = array<i64: 128, 128>}, {pipeline_mode = #tpu.pipeline_mode<synchronous>, transform_indices = @transform_7, window_bounds = array<i64: 1, 128>}, {transform_indices = @transform_8, window_bounds = array<i64: 16, 128>}]} {
    %c0 = arith.constant 0 : index
    %c0_0 = arith.constant 0 : index
    %0 = vector.load %arg2[%c0, %c0_0] : memref<16x128xbf16, #tpu.memory_space<vmem>>, vector<16x128xbf16>
    %c0_1 = arith.constant 0 : index
    %c0_2 = arith.constant 0 : index
    %1 = vector.load %arg3[%c0_1, %c0_2] : memref<128x128xbf16, #tpu.memory_space<vmem>>, vector<128x128xbf16>
    %cst = arith.constant dense<0.000000e+00> : vector<16x128xf32>
    %2 = tpu.matmul %0, %1, %cst {dimension_numbers = #tpu.dot_dimension_numbers<[1], [0], [0], [1], [0, 0, 1, 1], [], []>} : vector<16x128xbf16>, vector<128x128xbf16>, vector<16x128xf32> -> vector<16x128xf32>
    %c0_3 = arith.constant 0 : index
    %c0_4 = arith.constant 0 : index
    %3 = vector.load %arg4[%c0_3, %c0_4] : memref<1x128xf32, #tpu.memory_space<vmem>>, vector<1x128xf32>
    %4 = vector.broadcast %3 : vector<1x128xf32> to vector<16x128xf32>
    %5 = arith.addf %2, %4 : vector<16x128xf32>
    %cst_5 = arith.constant 0.000000e+00 : f32
    %6 = vector.broadcast %cst_5 : f32 to vector<16x128xf32>
    %7 = arith.maximumf %5, %6 : vector<16x128xf32>
    %8 = arith.truncf %7 : vector<16x128xf32> to vector<16x128xbf16>
    %c0_6 = arith.constant 0 : index
    %c0_7 = arith.constant 0 : index
    %9 = vector.load %arg5[%c0_6, %c0_7] : memref<128x128xbf16, #tpu.memory_space<vmem>>, vector<128x128xbf16>
    %cst_8 = arith.constant dense<0.000000e+00> : vector<16x128xf32>
    %10 = tpu.matmul %8, %9, %cst_8 {dimension_numbers = #tpu.dot_dimension_numbers<[1], [0], [0], [1], [0, 0, 1, 1], [], []>} : vector<16x128xbf16>, vector<128x128xbf16>, vector<16x128xf32> -> vector<16x128xf32>
    %c0_9 = arith.constant 0 : index
    %c0_10 = arith.constant 0 : index
    %11 = vector.load %arg6[%c0_9, %c0_10] : memref<1x128xf32, #tpu.memory_space<vmem>>, vector<1x128xf32>
    %12 = vector.broadcast %11 : vector<1x128xf32> to vector<16x128xf32>
    %13 = arith.addf %10, %12 : vector<16x128xf32>
    %cst_11 = arith.constant 0.000000e+00 : f32
    %14 = vector.broadcast %cst_11 : f32 to vector<16x128xf32>
    %15 = arith.maximumf %13, %14 : vector<16x128xf32>
    %16 = arith.truncf %15 : vector<16x128xf32> to vector<16x128xbf16>
    %c0_12 = arith.constant 0 : index
    %c0_13 = arith.constant 0 : index
    %17 = vector.load %arg7[%c0_12, %c0_13] : memref<128x128xbf16, #tpu.memory_space<vmem>>, vector<128x128xbf16>
    %cst_14 = arith.constant dense<0.000000e+00> : vector<16x128xf32>
    %18 = tpu.matmul %16, %17, %cst_14 {dimension_numbers = #tpu.dot_dimension_numbers<[1], [0], [0], [1], [0, 0, 1, 1], [], []>} : vector<16x128xbf16>, vector<128x128xbf16>, vector<16x128xf32> -> vector<16x128xf32>
    %c0_15 = arith.constant 0 : index
    %c0_16 = arith.constant 0 : index
    %19 = vector.load %arg8[%c0_15, %c0_16] : memref<1x128xf32, #tpu.memory_space<vmem>>, vector<1x128xf32>
    %20 = vector.broadcast %19 : vector<1x128xf32> to vector<16x128xf32>
    %21 = arith.addf %18, %20 : vector<16x128xf32>
    %22 = math.tanh %21 : vector<16x128xf32>
    %c0_17 = arith.constant 0 : index
    %c0_18 = arith.constant 0 : index
    %23 = memref.load %arg1[%c0_17, %c0_18] : memref<1x1xf32, #tpu.memory_space<smem>>
    %24 = vector.broadcast %23 : f32 to vector<16x128xf32>
    %25 = arith.mulf %22, %24 : vector<16x128xf32>
    %c0_19 = arith.constant 0 : index
    %c0_20 = arith.constant 0 : index
    %26 = vector.load %arg9[%c0_19, %c0_20] : memref<16x128xf32, #tpu.memory_space<vmem>>, vector<16x128xf32>
    tpu.vector_store %arg9[%c0_19, %c0_20], %25 {strides = array<i32>} : memref<16x128xf32, #tpu.memory_space<vmem>>, vector<16x128xf32>,
    return
  }
  func.func @transform_0(%arg0: i32) -> (i32, i32) {
    %c0_i32 = arith.constant 0 : i32
    %c0_i32_0 = arith.constant 0 : i32
    %c0_i32_1 = arith.constant 0 : i32
    return %c0_i32, %c0_i32_0 : i32, i32
  }
  func.func @transform_1(%arg0: i32) -> (i32, i32) {
    %c0_i32 = arith.constant 0 : i32
    %c0_i32_0 = arith.constant 0 : i32
    return %arg0, %c0_i32 : i32, i32
  }
  func.func @transform_2(%arg0: i32) -> (i32, i32) {
    %c0_i32 = arith.constant 0 : i32
    %c0_i32_0 = arith.constant 0 : i32
    %c0_i32_1 = arith.constant 0 : i32
    return %c0_i32, %c0_i32_0 : i32, i32
  }
  func.func @transform_3(%arg0: i32) -> (i32, i32) {
    %c0_i32 = arith.constant 0 : i32
    %c0_i32_0 = arith.constant 0 : i32
    %c0_i32_1 = arith.constant 0 : i32
    return %c0_i32, %c0_i32_0 : i32, i32
  }
  func.func @transform_4(%arg0: i32) -> (i32, i32) {
    %c0_i32 = arith.constant 0 : i32
    %c0_i32_0 = arith.constant 0 : i32
    %c0_i32_1 = arith.constant 0 : i32
    return %c0_i32, %c0_i32_0 : i32, i32
  }
  func.func @transform_5(%arg0: i32) -> (i32, i32) {
    %c0_i32 = arith.constant 0 : i32
    %c0_i32_0 = arith.constant 0 : i32
    %c0_i32_1 = arith.constant 0 : i32
    return %c0_i32, %c0_i32_0 : i32, i32
  }
  func.func @transform_6(%arg0: i32) -> (i32, i32) {
    %c0_i32 = arith.constant 0 : i32
    %c0_i32_0 = arith.constant 0 : i32
    %c0_i32_1 = arith.constant 0 : i32
    return %c0_i32, %c0_i32_0 : i32, i32
  }
  func.func @transform_7(%arg0: i32) -> (i32, i32) {
    %c0_i32 = arith.constant 0 : i32
    %c0_i32_0 = arith.constant 0 : i32
    %c0_i32_1 = arith.constant 0 : i32
    return %c0_i32, %c0_i32_0 : i32, i32
  }
  func.func @transform_8(%arg0: i32) -> (i32, i32) {
    %c0_i32 = arith.constant 0 : i32
    %c0_i32_0 = arith.constant 0 : i32
    return %arg0, %c0_i32 : i32, i32
  }
}

</mosaic_0001>

<bundles_post_ra>
// kernel: tpu_custom_call.1
= control target key start
LH: loop header
LB: loop body
LE: loop exit
PB: predicated region body
PF: predicated region fallthrough
CT: control target
= control target key end

     0   :  { %14 = vsyncpa [#allocation4], 0  ;;  %s921_s0 = inlined_call_operand.<no memory space> [shape: f32[1,1], index: 0, kind: input, shape index: {}]   ;;  %s922_s1 = inlined_call_operand.hbm [shape: bf16[16,128], index: 1, kind: input, shape index: {}]   ;;  %s923_s2 = inlined_call_operand.hbm [shape: bf16[128,128], index: 2, kind: input, shape index: {}]   ;;  %s924_s3 = inlined_call_operand.vmem [shape: f32[1,128], index: 3, kind: input, shape index: {}]   ;;  %s925_s4 = inlined_call_operand.hbm [shape: bf16[128,128], index: 4, kind: input, shape index: {}]   ;;  %s926_s5 = inlined_call_operand.vmem [shape: f32[1,128], index: 5, kind: input, shape index: {}]   ;;  %s927_s6 = inlined_call_operand.hbm [shape: bf16[128,128], index: 6, kind: input, shape index: {}]   ;;  %s928_s7 = inlined_call_operand.vmem [shape: f32[1,128], index: 7, kind: input, shape index: {}]   ;;  %s929_s8 = inlined_call_operand.hbm [shape: f32[16,128], index: 8, kind: output, shape index: {}]  }
   0x1   :  { %15 = vsyncpa [#allocation7], 0 }
   0x2   :  { %16 = vsyncpa [#allocation10], 0 }
   0x3   :  { %17 = vsyncpa [#allocation5], 0  ;;  %s737_s27 = smov [#allocation6]   ;;  %s738_s29 = smov [#allocation3]  }
   0x4   :  { %s37_s28 = sshll.u32 %s737_s27, 4  ;;  %s25_s30 = sshll.u32 %s738_s29, 4  ;;  %s38_s28 = int_to_ptr.vmem [resolvable:$true] %s37_s28  ;;  %s793_s30 = int_to_ptr.vmem [resolvable:$true] %s25_s30 }
   0x5   :  { %s619_s11 = scalar_lea.hbm %s923_s2, 1024 }
   0x6   :  { %p620_p0 = scmp.ne.s32.totalorder %s923_s2, %s619_s11  ;;  %p623_p1 = scmp.lt.u32.totalorder %s619_s11, %s923_s2 }
   0x8   :  { %p625_p2 = pnand %p623_p1, %p620_p0 }
   0xa   :  { %628 = shalt.err (!%p625_p2)
}
   0xb   :  { %s629_s16 = scalar_lea.vmem %s38_s28, 1024  ;;  %p634_p4 = scmp.lt.s32.totalorder %s38_s28, %s38_s28 }
   0xc   :  { %p630_p3 = scmp.ne.s32.totalorder %s38_s28, %s629_s16  ;;  %p635_p5 = scmp.lt.s32.totalorder %s629_s16, %s629_s16 }
   0xe   :  { %p636_p6 = por %p635_p5, %p634_p4 }
  0x10   :  { %p637_p7 = pnand %p636_p6, %p630_p3 }
  0x12   :  { %640 = shalt.err (!%p637_p7)
}
  0x13   :  { %s739_s17 = smov 64   ;;  %s740_s18 = smov 4  }
  0x14   :  { %43 = dma.hbm_to_vmem [thread:$0]  %s923_s2, 1024, %s38_s28, [#allocation7], %s739_s17, %s739_s17, %s740_s18  }
  0x15   :  { %s641_s23 = scalar_lea.hbm %s922_s1, 128 }
  0x16   :  { %p642_p8 = scmp.ne.s32.totalorder %s922_s1, %s641_s23  ;;  %p645_p9 = scmp.lt.u32.totalorder %s641_s23, %s922_s1 }
  0x18   :  { %p647_p10 = pnand %p645_p9, %p642_p8 }
  0x1a   :  { %650 = shalt.err (!%p647_p10)
}
  0x1b   :  { %s651_s29 = scalar_lea.vmem %s793_s30, 128  ;;  %p656_p12 = scmp.lt.s32.totalorder %s793_s30, %s793_s30 }
  0x1c   :  { %p652_p11 = scmp.ne.s32.totalorder %s793_s30, %s651_s29  ;;  %p657_p13 = scmp.lt.s32.totalorder %s651_s29, %s651_s29 }
  0x1e   :  { %p658_p0 = por %p657_p13, %p656_p12 }
  0x20   :  { %p659_p1 = pnand %p658_p0, %p652_p11 }
  0x22   :  { %662 = shalt.err (!%p659_p1)
}
  0x23   :  { %31 = dma.hbm_to_vmem [thread:$0]  %s922_s1, 128, %s793_s30, [#allocation4], %s739_s17, %s739_s17, %s740_s18  }
  0x24   :  { %s741_s9 = smov [#allocation8]   ;;  %s742_s11 = smov [#allocation9]  }
  0x25   :  { %s51_s10 = sshll.u32 %s741_s9, 4  ;;  %s65_s12 = sshll.u32 %s742_s11, 4  ;;  %s52_s10 = int_to_ptr.vmem [resolvable:$true] %s51_s10  ;;  %s830_s12 = int_to_ptr.vmem [resolvable:$true] %s65_s12 }
  0x26   :  { %s663_s15 = scalar_lea.hbm %s925_s4, 1024 }
  0x27   :  { %p664_p2 = scmp.ne.s32.totalorder %s925_s4, %s663_s15  ;;  %p667_p3 = scmp.lt.u32.totalorder %s663_s15, %s925_s4 }
  0x29   :  { %p669_p4 = pnand %p667_p3, %p664_p2 }
  0x2b   :  { %672 = shalt.err (!%p669_p4)
}
  0x2c   :  { %s673_s1 = scalar_lea.vmem %s52_s10, 1024  ;;  %p678_p6 = scmp.lt.s32.totalorder %s52_s10, %s52_s10 }
  0x2d   :  { %p674_p5 = scmp.ne.s32.totalorder %s52_s10, %s673_s1  ;;  %p679_p7 = scmp.lt.s32.totalorder %s673_s1, %s673_s1 }
  0x2f   :  { %p680_p8 = por %p679_p7, %p678_p6 }
  0x31   :  { %p681_p9 = pnand %p680_p8, %p674_p5 }
  0x33   :  { %684 = shalt.err (!%p681_p9)
}
  0x34   :  { %57 = dma.hbm_to_vmem [thread:$0]  %s925_s4, 1024, %s52_s10, [#allocation7], %s739_s17, %s739_s17, %s740_s18  }
  0x35   :  { %s685_s25 = scalar_lea.hbm %s927_s6, 1024 }
  0x36   :  { %p686_p10 = scmp.ne.s32.totalorder %s927_s6, %s685_s25  ;;  %p689_p11 = scmp.lt.u32.totalorder %s685_s25, %s927_s6 }
  0x38   :  { %p691_p12 = pnand %p689_p11, %p686_p10 }
  0x3a   :  { %694 = shalt.err (!%p691_p12)
}
  0x3b   :  { %s695_s28 = scalar_lea.vmem %s830_s12, 1024  ;;  %p700_p0 = scmp.lt.s32.totalorder %s830_s12, %s830_s12 }
  0x3c   :  { %p696_p13 = scmp.ne.s32.totalorder %s830_s12, %s695_s28  ;;  %p701_p1 = scmp.lt.s32.totalorder %s695_s28, %s695_s28 }
  0x3e   :  { %p702_p2 = por %p701_p1, %p700_p0 }
  0x40   :  { %p703_p3 = pnand %p702_p2, %p696_p13 }
  0x42   :  { %706 = shalt.err (!%p703_p3)
}
  0x43   :  { %71 = dma.hbm_to_vmem [thread:$0]  %s927_s6, 1024, %s830_s12, [#allocation10], %s739_s17, %s739_s17, %s740_s18  }
  0x44   :  { %729 = dma.done.wait [#allocation4], 128  }
  0x45   :  { %730 = vsyncadd [#allocation4], 4294967168 }
  0x46   :  { %731 = dma.done.wait [#allocation7], 2048  }
  0x47   :  { %732 = vsyncadd [#allocation7], 4294965248 }
  0x48   :  { %733 = dma.done.wait [#allocation10], 1024  }
  0x49   :  { %734 = vsyncadd [#allocation10], 4294966272  ;;  %v743_v0 = vmov 0.0   ;;  %vm744_vm0 = vmmov 0   ;;  %v590_v1 = vld [vmem:[#allocation6] sm:$0xff]   ;;  %v591_v2 = vld [vmem:[#allocation6 + $0x8] sm:$0xff]   ;;  %v440_v53 = vstv %s921_s0 }
  0x4a   :  { %519 = vmatprep.subr.bf16.mxu0 %v743_v0  ;;  %535 = vmatprep.mubr.msk.bf16.mxu0 %vm744_vm0, %v743_v0  ;;  %v592_v3 = vld [vmem:[#allocation6 + $0x10] sm:$0xff]   ;;  %v599_v4 = vld [vmem:[#allocation8] sm:$0xff]   ;;  %v593_v5 = vld [vmem:[#allocation6 + $0x18] sm:$0xff]   ;;  %s745_s13 = smov [#allocation11]  }
  0x4b   :  { %539 = vmatprep.subr.bf16.mxu1 %v743_v0  ;;  %555 = vmatprep.mubr.msk.bf16.mxu1 %vm744_vm0, %v743_v0  ;;  %v600_v6 = vld [vmem:[#allocation8 + $0x8] sm:$0xff]   ;;  %v594_v7 = vld [vmem:[#allocation6 + $0x20] sm:$0xff]   ;;  %v601_v8 = vld [vmem:[#allocation8 + $0x10] sm:$0xff]   ;;  %s450_s14 = sshll.u32 %s745_s13, 4  ;;  %s451_s14 = int_to_ptr.vmem [resolvable:$true] %s450_s14 }
  0x4c   :  { %520 = vmatpush3.bf16.msra.mxu0 %v590_v1  ;;  %540 = vmatpush3.bf16.msra.mxu1 %v599_v4  ;;  %v595_v9 = vld [vmem:[#allocation6 + $0x28] sm:$0xff]   ;;  %v602_v10 = vld [vmem:[#allocation8 + $0x18] sm:$0xff]   ;;  %v596_v11 = vld [vmem:[#allocation6 + $0x30] sm:$0xff]   ;;  %p712_p5 = scmp.lt.s32.totalorder %s451_s14, %s451_s14 }
  0x4d   :  { %521 = vmatprep.subr.bf16.mxu0 %v743_v0  ;;  %541 = vmatprep.subr.bf16.mxu1 %v743_v0  ;;  %v603_v12 = vld [vmem:[#allocation8 + $0x20] sm:$0xff]   ;;  %v597_v13 = vld [vmem:[#allocation6 + $0x38] sm:$0xff]   ;;  %v604_v14 = vld [vmem:[#allocation8 + $0x28] sm:$0xff]  }
  0x4e   :  { %v598_v15 = vld [vmem:[#allocation3] sm:$0xff]   ;;  %v605_v16 = vld [vmem:[#allocation8 + $0x30] sm:$0xff]   ;;  %v607_v18 = vld [vmem:[#allocation9] sm:$0xff]  }
  0x4f   :  { %v606_v17 = vld [vmem:[#allocation8 + $0x38] sm:$0xff]   ;;  %v608_v19 = vld [vmem:[#allocation9 + $0x8] sm:$0xff]   ;;  %v609_v20 = vld [vmem:[#allocation9 + $0x10] sm:$0xff]  }
  0x50   :  { %522 = vmatpush3.bf16.msra.mxu0 %v591_v2  ;;  %542 = vmatpush3.bf16.msra.mxu1 %v600_v6  ;;  %v610_v21 = vld [vmem:[#allocation9 + $0x18] sm:$0xff]   ;;  %v611_v22 = vld [vmem:[#allocation9 + $0x20] sm:$0xff]   ;;  %v612_v23 = vld [vmem:[#allocation9 + $0x28] sm:$0xff]  }
  0x51   :  { %523 = vmatprep.subr.bf16.mxu0 %v743_v0  ;;  %543 = vmatprep.subr.bf16.mxu1 %v743_v0  ;;  %v464_v24 = vld [vmem:[%s924_s3] ss:$0 sm:$0xff]  ;;  %v613_v34 = vld [vmem:[#allocation9 + $0x30] sm:$0xff]  }
  0x52   :  { %v614_v35 = vld [vmem:[#allocation9 + $0x38] sm:$0xff]  }
  0x53   :  { %v474_v36 = vld [vmem:[%s926_s5] ss:$0 sm:$0xff] }
  0x54   :  { %524 = vmatpush3.bf16.msra.mxu0 %v592_v3  ;;  %544 = vmatpush3.bf16.msra.mxu1 %v601_v8  ;;  %v483_v46 = vld [vmem:[%s928_s7] ss:$0 sm:$0xff]  ;;  %s707_s7 = scalar_lea.vmem %s451_s14, 256 }
  0x55   :  { %525 = vmatprep.subr.bf16.mxu0 %v743_v0  ;;  %545 = vmatprep.subr.bf16.mxu1 %v743_v0  ;;  %p708_p4 = scmp.ne.s32.totalorder %s451_s14, %s707_s7  ;;  %p713_p6 = scmp.lt.s32.totalorder %s707_s7, %s707_s7 }
  0x57   :  { %p714_p7 = por %p713_p6, %p712_p5 }
  0x58   :  { %526 = vmatpush3.bf16.msra.mxu0 %v593_v5  ;;  %546 = vmatpush3.bf16.msra.mxu1 %v602_v10 }
  0x59   :  { %527 = vmatprep.subr.bf16.mxu0 %v743_v0  ;;  %547 = vmatprep.subr.bf16.mxu1 %v743_v0  ;;  %p715_p8 = pnand %p714_p7, %p708_p4 }
  0x5c   :  { %528 = vmatpush3.bf16.msra.mxu0 %v594_v7  ;;  %548 = vmatpush3.bf16.msra.mxu1 %v603_v12 }
  0x5d   :  { %529 = vmatprep.subr.bf16.mxu0 %v743_v0  ;;  %549 = vmatprep.subr.bf16.mxu1 %v743_v0 }
  0x60   :  { %530 = vmatpush3.bf16.msra.mxu0 %v595_v9  ;;  %550 = vmatpush3.bf16.msra.mxu1 %v604_v14 }
  0x61   :  { %531 = vmatprep.subr.bf16.mxu0 %v743_v0  ;;  %551 = vmatprep.subr.bf16.mxu1 %v743_v0 }
  0x64   :  { %532 = vmatpush3.bf16.msra.mxu0 %v596_v11  ;;  %552 = vmatpush3.bf16.msra.mxu1 %v605_v16 }
  0x65   :  { %533 = vmatprep.subr.bf16.mxu0 %v743_v0  ;;  %553 = vmatprep.subr.bf16.mxu1 %v743_v0 }
  0x68   :  { %534 = vmatpush3.bf16.msra.mxu0 %v597_v13  ;;  %554 = vmatpush3.bf16.msra.mxu1 %v606_v17 }
  0x69   :  { %559 = vmatprep.subr.bf16.mxu0 %v743_v0 }
  0x6b   :  { %536 = vmatmul.mubr.bf16.vlgmr.msra.gmra.mrb[0].mxu0 %v598_v15 }
  0x6c   :  { %575 = vmatprep.mubr.msk.bf16.mxu0 %vm744_vm0, %v743_v0  ;;  %560 = vmatpush3.bf16.msra.mxu0 %v607_v18 }
  0x6d   :  { %561 = vmatprep.subr.bf16.mxu0 %v743_v0 }
  0x70   :  { %562 = vmatpush3.bf16.msra.mxu0 %v608_v19 }
  0x71   :  { %563 = vmatprep.subr.bf16.mxu0 %v743_v0 }
  0x74   :  { %564 = vmatpush3.bf16.msra.mxu0 %v609_v20 }
  0x75   :  { %565 = vmatprep.subr.bf16.mxu0 %v743_v0 }
  0x78   :  { %566 = vmatpush3.bf16.msra.mxu0 %v610_v21 }
  0x79   :  { %567 = vmatprep.subr.bf16.mxu0 %v743_v0 }
  0x7c   :  { %568 = vmatpush3.bf16.msra.mxu0 %v611_v22 }
  0x7d   :  { %569 = vmatprep.subr.bf16.mxu0 %v743_v0 }
  0x80   :  { %570 = vmatpush3.bf16.msra.mxu0 %v612_v23 }
  0x81   :  { %571 = vmatprep.subr.bf16.mxu0 %v743_v0 }
  0x84   :  { %572 = vmatpush3.bf16.msra.mxu0 %v613_v34 }
  0x85   :  { %573 = vmatprep.subr.bf16.mxu0 %v743_v0 }
  0x88   :  { %574 = vmatpush3.bf16.msra.mxu0 %v614_v35 }
 0x13e   :  { %v200_v25 = vpop.f32.mrb[0].mxu0 }
 0x13f   :  { %v201_v26 = vadd.f32 %v464_v24, %v200_v25  ;;  %v537_v27 = vpop.f32.mrb[1].mxu0 }
 0x140   :  { %v203_v28 = vpop.f32.mrb[2].mxu0 }
 0x141   :  { %v204_v29 = vadd.f32 %v464_v24, %v203_v28  ;;  %v538_v30 = vpop.f32.mrb[3].mxu0  ;;  %v207_v31 = vmax.f32 %v201_v26, 0.0 }
 0x143   :  { %v208_v32 = vmax.f32 %v204_v29, 0.0 }
 0x145   :  { %v209_v33 = vpack.c.bf16 %v208_v32, %v207_v31 }
 0x147   :  { %556 = vmatmul.mubr.bf16.vlgmr.msra.gmra.mrb[0].mxu1 %v209_v33 }
 0x21a   :  { %v315_v37 = vpop.f32.mrb[0].mxu1 }
 0x21b   :  { %v316_v38 = vadd.f32 %v474_v36, %v315_v37  ;;  %v557_v39 = vpop.f32.mrb[1].mxu1 }
 0x21c   :  { %v318_v40 = vpop.f32.mrb[2].mxu1 }
 0x21d   :  { %v319_v41 = vadd.f32 %v474_v36, %v318_v40  ;;  %v558_v42 = vpop.f32.mrb[3].mxu1  ;;  %v322_v43 = vmax.f32 %v316_v38, 0.0 }
 0x21f   :  { %v323_v44 = vmax.f32 %v319_v41, 0.0 }
 0x221   :  { %v324_v45 = vpack.c.bf16 %v323_v44, %v322_v43 }
 0x223   :  { %576 = vmatmul.mubr.bf16.vlgmr.msra.gmra.mrb[4].mxu0 %v324_v45 }
 0x2f6   :  { %v430_v47 = vpop.f32.mrb[4].mxu0 }
 0x2f7   :  { %v431_v48 = vadd.f32 %v483_v46, %v430_v47  ;;  %v577_v49 = vpop.f32.mrb[5].mxu0 }
 0x2f8   :  { %v433_v50 = vpop.f32.mrb[6].mxu0 }
 0x2f9   :  { %615 = vtanh.f32 %v431_v48  ;;  %v434_v51 = vadd.f32 %v483_v46, %v433_v50  ;;  %v578_v52 = vpop.f32.mrb[7].mxu0 }
 0x2fb   :  { %617 = vtanh.f32 %v434_v51 }
 0x303   :  { %v616_v54 = vpop.eup %615 }
 0x304   :  { %v441_v55 = vmul.f32 %v616_v54, %v440_v53 }
 0x305   :  { %v618_v56 = vpop.eup %617 }
 0x306   :  { %v442_v57 = vmul.f32 %v618_v56, %v440_v53  ;;  %443 = vst [vmem:[#allocation11] sm:$0xff] %v441_v55 }
 0x308   :  { %444 = vst [vmem:[#allocation11 + $0x8] sm:$0xff] %v442_v57 }
 0x309   :  { %718 = shalt.err (!%p715_p8)
}
 0x30a   :  { %s719_s0 = scalar_lea.hbm %s929_s8, 256 }
 0x30b   :  { %p720_p9 = scmp.ne.s32.totalorder %s929_s8, %s719_s0  ;;  %p723_p10 = scmp.lt.u32.totalorder %s719_s0, %s929_s8 }
 0x30d   :  { %p725_p11 = pnand %p723_p10, %p720_p9 }
 0x30f   :  { %728 = shalt.err (!%p725_p11)
}
 0x310   :  { %s746_s30 = smov 128   ;;  %s747_s22 = smov 8  }
 0x311   :  { %456 = dma.vmem_to_hbm [thread:$0]  %s451_s14, 256, %s929_s8, [#allocation5], %s746_s30, %s746_s30, %s747_s22  }
 0x312   :  { %735 = dma.done.wait [#allocation5], 256  }
 0x313   :  { %736 = vsyncadd [#allocation5], 4294967040 }
 0x314   :  { %460 = vsyncpa [#allocation4], 1 }
 0x315   :  { %461 = vsyncpa [#allocation7], 1 }
 0x316   :  { %462 = vsyncpa [#allocation10], 1 }
 0x317   :  { %463 = vsyncpa [#allocation5], 1 }

</bundles_post_ra>
